<compile_context>
chip_gen: v5e
topology: v5e:2x2
jax: 0.10.0
libtpu: 0.0.40
codegen_flags: <defaults>
</compile_context>

<pallas_src>
from typing import Literal, Optional, Tuple

import jax
import jax.numpy as jnp
from jax.experimental import pallas as pl
from jax.experimental.pallas import tpu as pltpu


def _round_up(x: int, m: int) -> int:
    return ((x + m - 1) // m) * m


def _vmem_budget_bytes() -> int:
    """~3/4 of the physical per-core VMEM (96 MiB v5e/v6e, 48 MiB v7x)."""
    cap = 64 << 20  # conservative fallback (v7x per-TC physical)
    try:
        info_cap = int(pltpu.get_tpu_info().vmem_capacity_bytes)
        if info_cap > 0:
            cap = info_cap
    except Exception:
        pass
    return (cap * 3) // 4


def _choose_tiles(N: int, V: int, itemsize: int, vmem_budget: int, *,
                  tile_n_cap: int, tile_v_cap: Optional[int]):
    """Pick (tile_n, tile_v, mask_cols, sub).

    Per-logit working-set accounting: double-buffered native input plus the
    compiler-materialized f32 cast, int32 iota and f32 exp temporaries
    (conservative 24 extra bytes/element) so big tiles never overshoot the
    scoped-VMEM limit (important on v7x's 64 MiB VMEM)."""
    sub = 8 * max(1, 4 // max(1, itemsize))      # sublane packing (8 f32 / 16 bf16)
    n_rounded = _round_up(N, sub)
    per_elem = 2 * itemsize + 24
    per_row_overhead = 128 * 4 * 8               # lane-padded (rows,1) side buffers
    avail = max(vmem_budget - (4 << 20), 1 << 20)
    target_block = 8 << 20                       # aim ~8 MiB logits DMA per step

    v_cap = V if tile_v_cap is None else max(1, min(V, tile_v_cap))

    if v_cap >= V and (V * per_elem + per_row_overhead) * sub <= avail:
        # Whole vocab in one tile: contiguous DMA, no online-LSE pass.
        tile_v = V
        rows = min(avail // (V * per_elem + per_row_overhead),
                   max(target_block // max(V * itemsize, 1), sub),
                   tile_n_cap, n_rounded)
        if n_rounded > 256:                      # keep >= 2 row tiles (megacore)
            rows = min(rows, _round_up((n_rounded + 1) // 2, sub))
        tile_n = max(sub, (rows // sub) * sub)
        if n_rounded > tile_n >= 128:
            tile_n = (tile_n // 128) * 128       # 128-aligned row tiles
        mask_cols = False
    else:
        # Stream the vocab with an online log-sum-exp.
        tile_n = max(sub, (min(256, tile_n_cap, n_rounded) // sub) * sub)
        avail_v = max(avail - tile_n * per_row_overhead, 1 << 20)
        fit = (avail_v // (tile_n * per_elem)) // 128 * 128
        fit = min(fit, _round_up(v_cap, 128))
        fit = max(fit, 128)
        # Prefer a multiple-of-128 divisor of V -> no ragged last tile, no mask.
        tile_v = 0
        cand = fit
        while cand >= 128:
            if V % cand == 0:
                tile_v = cand
                break
            cand -= 128
        if tile_v < max(fit // 2, 1024):
            tile_v = fit
        mask_cols = (V % tile_v) != 0
    return tile_n, tile_v, mask_cols, sub


def _make_ce_kernel(ignore_index: int, vocab: int, tile_v: int, mask_cols: bool,
                    want_per_row: bool, single_pass: bool):
    """CE kernel over a (row-tile, vocab-tile) grid.

    single_pass=True (tile_v covers the whole vocab): no scratch accumulators.
    Otherwise: online log-sum-exp across the vocab grid axis."""

    def kernel(logits_ref, labels_ref, *rest):
        if single_pass:
            if want_per_row:
                stats_ref, loss_ref = rest
            else:
                (stats_ref,) = rest
                loss_ref = None
            m_sc = s_sc = p_sc = None
        else:
            if want_per_row:
                stats_ref, loss_ref, m_sc, s_sc, p_sc = rest
            else:
                stats_ref, m_sc, s_sc, p_sc = rest
                loss_ref = None

        x = logits_ref[...].astype(jnp.float32)          # (tn, tv) f32
        lab = labels_ref[...]                            # (tn, 1) int32
        tn, tv = x.shape

        # Local (per-tile) column iota; the label is shifted by a scalar
        # instead of adding j*tile_v to every element.
        col_local = jax.lax.broadcasted_iota(jnp.int32, (tn, tv), 1)

        if single_pass:
            lab_local = lab
            if mask_cols:                                # tile wider than vocab
                x = jnp.where(col_local < vocab, x, -jnp.inf)
        else:
            j = pl.program_id(1)
            n_vt = pl.num_programs(1)
            lab_local = lab - j * tile_v
            if mask_cols:                                # ragged last vocab tile
                x = jnp.where(col_local < vocab - j * tile_v, x, -jnp.inf)

        # One pass over the tile: row max, sum-exp, picked (label) logit.
        m_tile = jnp.max(x, axis=-1, keepdims=True)                       # (tn,1)
        sum_tile = jnp.sum(jnp.exp(x - m_tile), axis=-1, keepdims=True)   # (tn,1)
        p_tile = jnp.sum(jnp.where(col_local == lab_local, x, 0.0),
                         axis=-1, keepdims=True)                          # (tn,1)

        def finalize(lse, picked):
            valid = lab != ignore_index                  # padded / ignored rows
            per_row = jnp.where(valid, lse - picked, 0.0)
            ce = jnp.sum(per_row, axis=(0, 1), keepdims=True)             # (1,1)
            cnt = jnp.sum(valid.astype(jnp.float32), axis=(0, 1), keepdims=True)
            # Lane-dense per-row-tile partial stats: row 0, lanes 0/1.
            row = jax.lax.broadcasted_iota(jnp.int32, (8, 128), 0)
            lane = jax.lax.broadcasted_iota(jnp.int32, (8, 128), 1)
            r0 = row == 0
            stats_ref[...] = (jnp.where(r0 & (lane == 0), ce, 0.0)
                              + jnp.where(r0 & (lane == 1), cnt, 0.0))
            if want_per_row:
                # TODO(synk): lane-dense per-row output skipped — it needs a
                # (tile_n,1)->(...,128) sublane->lane relayout in-kernel; the
                # column layout is kept for lowering safety (output is tiny
                # relative to the streamed logits anyway).
                loss_ref[...] = per_row

        if single_pass:
            finalize(m_tile + jnp.log(sum_tile), p_tile)
        else:
            @pl.when(j == 0)
            def _init():
                m_sc[...] = m_tile
                s_sc[...] = sum_tile
                p_sc[...] = p_tile

            @pl.when(j > 0)
            def _update():
                m_prev = m_sc[...]
                m_new = jnp.maximum(m_prev, m_tile)
                s_sc[...] = (s_sc[...] * jnp.exp(m_prev - m_new)
                             + sum_tile * jnp.exp(m_tile - m_new))
                p_sc[...] = p_sc[...] + p_tile
                m_sc[...] = m_new

            @pl.when(j == n_vt - 1)
            def _fin():
                finalize(m_sc[...] + jnp.log(s_sc[...]), p_sc[...])

    return kernel


def _ce_loss_pallas(logits2d: jnp.ndarray, labels1d: jnp.ndarray,
                    ignore_index: int, want_per_row: bool,
                    *, tile_n_cap: int = 2048, tile_v_cap: Optional[int] = None):
    """Runs the Pallas CE kernel on (N, V) logits / (N,) labels.

    Returns (per_row or None, ce_sum, valid_count)."""
    N, V = int(logits2d.shape[0]), int(logits2d.shape[1])
    itemsize = jnp.dtype(logits2d.dtype).itemsize

    vmem_budget = _vmem_budget_bytes()
    tile_n, tile_v, mask_cols, _sub = _choose_tiles(
        N, V, itemsize, vmem_budget, tile_n_cap=tile_n_cap, tile_v_cap=tile_v_cap)

    n_i = -(-N // tile_n)
    n_j = -(-V // tile_v)
    n_pad = n_i * tile_n
    single_pass = (n_j == 1)

    # Only the tiny label vector is padded (with ignore_index); the logits are
    # streamed in their native dtype straight from HBM, ragged tiles masked.
    labels = labels1d.astype(jnp.int32)
    if n_pad != N:
        labels = jnp.pad(labels, (0, n_pad - N), constant_values=ignore_index)
    labels2d = labels.reshape(n_pad, 1)

    in_specs = [
        pl.BlockSpec((tile_n, tile_v), lambda i, j: (i, j)),
        pl.BlockSpec((tile_n, 1), lambda i, j: (i, 0)),
    ]
    out_shapes = [jax.ShapeDtypeStruct((n_i * 8, 128), jnp.float32)]
    out_specs = [pl.BlockSpec((8, 128), lambda i, j: (i, 0))]
    if want_per_row:
        out_shapes.append(jax.ShapeDtypeStruct((n_pad, 1), jnp.float32))
        out_specs.append(pl.BlockSpec((tile_n, 1), lambda i, j: (i, 0)))

    scratch = [] if single_pass else [pltpu.VMEM((tile_n, 1), jnp.float32)] * 3

    cost = pl.CostEstimate(
        flops=3 * N * V,
        transcendentals=N * V,
        bytes_accessed=N * V * itemsize + N * 4 + n_i * 8 * 128 * 4
                       + (n_pad * 4 if want_per_row else 0),
    )

    # TODO(synk): pl.Buffered(3) on the logits BlockSpec (v6e, if xprof shows
    # exposed DMA on the vocab axis) is left at the default double buffering.
    result = pl.pallas_call(
        _make_ce_kernel(ignore_index, V, tile_v, mask_cols, want_per_row,
                        single_pass),
        out_shape=tuple(out_shapes),
        grid_spec=pltpu.PrefetchScalarGridSpec(
            num_scalar_prefetch=0,
            grid=(n_i, n_j),
            in_specs=in_specs,
            out_specs=tuple(out_specs),
            scratch_shapes=scratch,
        ),
        compiler_params=pltpu.CompilerParams(
            dimension_semantics=("parallel", "arbitrary"),
            vmem_limit_bytes=int(vmem_budget),
        ),
        cost_estimate=cost,
    )(logits2d, labels2d)

    if want_per_row:
        stats, per_row_padded = result
        per_row = per_row_padded[:N, 0]
    else:
        stats = result[0] if isinstance(result, (tuple, list)) else result
        per_row = None

    ce_sum = jnp.sum(stats[:, 0])
    cnt = jnp.sum(stats[:, 1])
    return per_row, ce_sum, cnt


class CELossFnWrapper:
    """JAX/Pallas equivalent of the PyTorch `_CELossFnWrapper`."""

    def __init__(self, ignore_index: int = -100,
                 reduction: Literal['mean', 'sum', 'none'] = 'mean',
                 z_loss_multiplier: Optional[float] = None):
        self.ignore_index = ignore_index
        self.reduction = reduction
        self.z_loss_multiplier = z_loss_multiplier
        # TODO(synk): tensor-parallel (DTensor) path of the reference module is
        # not applicable to this single-device Pallas port.
        self.tp_enabled = False
        # Internal tiling knobs (exposed mainly for testing).
        self._tile_n_cap = 2048
        self._tile_v_cap: Optional[int] = None

    def __call__(self, logits: jnp.ndarray, labels: jnp.ndarray
                 ) -> Tuple[jnp.ndarray, Optional[jnp.ndarray]]:
        if logits.shape[:-1] != tuple(labels.shape):
            raise RuntimeError(
                f'expected labels to have shape {logits.shape[:-1]}, '
                f'but found {tuple(labels.shape)} instead')
        V = logits.shape[-1]
        logits_for_loss = logits.reshape(-1, V)
        labels_for_loss = labels.reshape(-1)

        want_per_row = (self.reduction == 'none')
        per_row, ce_sum, cnt = _ce_loss_pallas(
            logits_for_loss, labels_for_loss, self.ignore_index, want_per_row,
            tile_n_cap=self._tile_n_cap, tile_v_cap=self._tile_v_cap)

        if self.reduction == 'mean':
            ce_loss = ce_sum / cnt
        elif self.reduction == 'sum':
            ce_loss = ce_sum
        else:  # 'none'
            ce_loss = per_row.reshape(labels.shape)

        # The reference forward never sets compute_z_loss=True, so z_loss is
        # always None (z statistics are therefore not computed in-kernel).
        z_loss = None
        return ce_loss, z_loss


if __name__ == "__main__":
    def ref_ce(logits, labels, ignore_index=-100):
        V = logits.shape[-1]
        lp = jax.nn.log_softmax(
            logits.reshape(-1, V).astype(jnp.float32), axis=-1)
        lab = labels.reshape(-1)
        valid = lab != ignore_index
        picked = jnp.take_along_axis(
            lp, jnp.clip(lab, 0, V - 1)[:, None], axis=-1)[:, 0]
        per_row = jnp.where(valid, -picked, 0.0)
        return per_row, jnp.sum(per_row) / jnp.sum(valid)

    key = jax.random.PRNGKey(0)

    # --- Test 1: small 'mean' case (single-pass whole-vocab path) ---
    B, S, V = 2, 8, 128
    k1, k2 = jax.random.split(key)
    logits = jax.random.normal(k1, (B, S, V), dtype=jnp.float32)
    labels = jax.random.randint(k2, (B, S), 0, V, dtype=jnp.int32)
    labels = labels.at[0, 0].set(-100).at[1, 3].set(-100)

    loss_fn = CELossFnWrapper(ignore_index=-100, reduction='mean',
                              z_loss_multiplier=1e-4)
    ce_loss, z_loss = loss_fn(logits, labels)
    ce_loss = jax.block_until_ready(ce_loss)
    _, ref_mean = ref_ce(logits, labels)
    assert z_loss is None
    assert jnp.allclose(ce_loss, ref_mean, rtol=1e-5, atol=1e-5), (ce_loss, ref_mean)

    # --- Test 2: 'none', f32, V not a multiple of 128 (lane-padded single
    # tile reductions), N a multiple of 128 ---
    B2, S2, V2 = 2, 128, 160
    k3, k4 = jax.random.split(k1)
    logits2 = 4.0 * jax.random.normal(k3, (B2, S2, V2), dtype=jnp.float32)
    labels2 = jax.random.randint(k4, (B2, S2), 0, V2, dtype=jnp.int32)
    labels2 = labels2.at[0, 5].set(-100).at[1, 100].set(-100)

    loss_fn2 = CELossFnWrapper(ignore_index=-100, reduction='none')
    per_row2, _ = loss_fn2(logits2, labels2)
    per_row2 = jax.block_until_ready(per_row2)
    ref_rows2, _ = ref_ce(logits2, labels2)
    assert per_row2.shape == (B2, S2)
    assert jnp.allclose(per_row2.reshape(-1), ref_rows2, rtol=1e-4, atol=1e-4), (
        per_row2, ref_rows2)

    # --- Test 3: bf16 logits, forced vocab streaming (online LSE), ragged
    # row tile and ragged (masked) last vocab tile ---
    B3, S3, V3 = 1, 19, 200
    k5, k6 = jax.random.split(k3)
    logits3 = (8.0 * jax.random.normal(k5, (B3, S3, V3),
                                       dtype=jnp.float32)).astype(jnp.bfloat16)
    labels3 = jax.random.randint(k6, (B3, S3), 0, V3, dtype=jnp.int32)
    labels3 = labels3.at[0, 2].set(-100).at[0, 17].set(-100)
    ref_rows3, _ = ref_ce(logits3, labels3)

    loss_fn3 = CELossFnWrapper(ignore_index=-100, reduction='sum')
    loss_fn3._tile_n_cap = 16      # force ragged row tiling (19 rows -> 2 tiles)
    loss_fn3._tile_v_cap = 128     # force vocab streaming with ragged last tile
    ce_sum3, _ = loss_fn3(logits3, labels3)
    ce_sum3 = jax.block_until_ready(ce_sum3)
    assert jnp.allclose(ce_sum3, jnp.sum(ref_rows3), rtol=2e-4, atol=2e-4), (
        ce_sum3, jnp.sum(ref_rows3))

    loss_fn4 = CELossFnWrapper(ignore_index=-100, reduction='none')
    loss_fn4._tile_n_cap = 16
    loss_fn4._tile_v_cap = 128
    per_row4, _ = loss_fn4(logits3, labels3)
    per_row4 = jax.block_until_ready(per_row4)
    assert per_row4.shape == (B3, S3)
    assert jnp.allclose(per_row4.reshape(-1), ref_rows3, rtol=2e-4, atol=2e-4), (
        per_row4, ref_rows3)

    print("KERNEL_OK")
</pallas_src>

<mosaic_0001>
module attributes {stable_mosaic.version = 11 : i64} {
  func.func @kernel(%arg0: i32, %arg1: i32, %arg2: memref<16x128xf32, #tpu.memory_space<vmem>>, %arg3: memref<16x1xi32, #tpu.memory_space<vmem>>, %arg4: memref<8x128xf32, #tpu.memory_space<vmem>>) attributes {dimension_semantics = [#tpu.dimension_semantics<parallel>, #tpu.dimension_semantics<arbitrary>], iteration_bounds = array<i64: 1, 1>, scalar_prefetch = 0 : i64, scratch_operands = 0 : i64, tpu.core_type = #tpu.core_type<tc>, window_params = [{transform_indices = @transform_0, window_bounds = array<i64: 16, 128>}, {transform_indices = @transform_1, window_bounds = array<i64: 16, 1>}, {transform_indices = @transform_2, window_bounds = array<i64: 8, 128>}]} {
    %c0 = arith.constant 0 : index
    %c0_0 = arith.constant 0 : index
    %0 = vector.load %arg2[%c0, %c0_0] : memref<16x128xf32, #tpu.memory_space<vmem>>, vector<16x128xf32>
    %c0_1 = arith.constant 0 : index
    %c0_2 = arith.constant 0 : index
    %1 = vector.load %arg3[%c0_1, %c0_2] : memref<16x1xi32, #tpu.memory_space<vmem>>, vector<16x1xi32>
    %2 = tpu.iota {dimensions = array<i32: 1>} : vector<16x128xi32>
    %cst = arith.constant dense<0xFF800000> : vector<16xf32>
    %3 = vector.multi_reduction <maximumf>, %0, %cst [1] : vector<16x128xf32> to vector<16xf32>
    %4 = vector.shape_cast %3 : vector<16xf32> to vector<16x1xf32>
    %5 = vector.broadcast %4 : vector<16x1xf32> to vector<16x128xf32>
    %6 = arith.subf %0, %5 : vector<16x128xf32>
    %7 = math.exp %6 : vector<16x128xf32>
    %cst_3 = arith.constant dense<0.000000e+00> : vector<16xf32>
    %8 = vector.multi_reduction <add>, %7, %cst_3 [1] : vector<16x128xf32> to vector<16xf32>
    %9 = vector.shape_cast %8 : vector<16xf32> to vector<16x1xf32>
    %10 = vector.broadcast %1 : vector<16x1xi32> to vector<16x128xi32>
    %11 = arith.cmpi eq, %2, %10 : vector<16x128xi32>
    %cst_4 = arith.constant 0.000000e+00 : f32
    %12 = vector.broadcast %cst_4 : f32 to vector<16x128xf32>
    %13 = arith.select %11, %0, %12 : vector<16x128xi1>, vector<16x128xf32>
    %cst_5 = arith.constant dense<0.000000e+00> : vector<16xf32>
    %14 = vector.multi_reduction <add>, %13, %cst_5 [1] : vector<16x128xf32> to vector<16xf32>
    %15 = vector.shape_cast %14 : vector<16xf32> to vector<16x1xf32>
    %16 = math.log %9 : vector<16x1xf32>
    %17 = arith.addf %4, %16 : vector<16x1xf32>
    %c-100_i32 = arith.constant -100 : i32
    %18 = vector.broadcast %c-100_i32 : i32 to vector<16x1xi32>
    %19 = arith.cmpi ne, %1, %18 : vector<16x1xi32>
    %20 = arith.subf %17, %15 : vector<16x1xf32>
    %cst_6 = arith.constant 0.000000e+00 : f32
    %21 = vector.broadcast %cst_6 : f32 to vector<16x1xf32>
    %22 = arith.select %19, %20, %21 : vector<16x1xi1>, vector<16x1xf32>
    %23 = vector.shape_cast %22 : vector<16x1xf32> to vector<1x16x1xf32>
    %cst_7 = arith.constant dense<0.000000e+00> : vector<1xf32>
    %24 = vector.multi_reduction <add>, %23, %cst_7 [1, 2] : vector<1x16x1xf32> to vector<1xf32>
    %25 = vector.shape_cast %24 : vector<1xf32> to vector<1x1x1xf32>
    %26 = vector.extract %25[0, 0, 0] : f32 from vector<1x1x1xf32>
    %27 = vector.broadcast %26 : f32 to vector<1x1xf32>
    %28 = arith.extui %19 : vector<16x1xi1> to vector<16x1xi32>
    %29 = arith.sitofp %28 : vector<16x1xi32> to vector<16x1xf32>
    %30 = vector.shape_cast %29 : vector<16x1xf32> to vector<1x16x1xf32>
    %cst_8 = arith.constant dense<0.000000e+00> : vector<1xf32>
    %31 = vector.multi_reduction <add>, %30, %cst_8 [1, 2] : vector<1x16x1xf32> to vector<1xf32>
    %32 = vector.shape_cast %31 : vector<1xf32> to vector<1x1x1xf32>
    %33 = vector.extract %32[0, 0, 0] : f32 from vector<1x1x1xf32>
    %34 = vector.broadcast %33 : f32 to vector<1x1xf32>
    %35 = tpu.iota {dimensions = array<i32: 0>} : vector<8x128xi32>
    %36 = tpu.iota {dimensions = array<i32: 1>} : vector<8x128xi32>
    %c0_i32 = arith.constant 0 : i32
    %37 = vector.broadcast %c0_i32 : i32 to vector<8x128xi32>
    %38 = arith.cmpi eq, %35, %37 : vector<8x128xi32>
    %c0_i32_9 = arith.constant 0 : i32
    %39 = vector.broadcast %c0_i32_9 : i32 to vector<8x128xi32>
    %40 = arith.cmpi eq, %36, %39 : vector<8x128xi32>
    %41 = arith.andi %38, %40 : vector<8x128xi1>
    %cst_10 = arith.constant 0.000000e+00 : f32
    %42 = vector.shape_cast %27 : vector<1x1xf32> to vector<1x1xf32>
    %43 = vector.broadcast %42 : vector<1x1xf32> to vector<8x128xf32>
    %44 = vector.broadcast %cst_10 : f32 to vector<8x128xf32>
    %45 = arith.select %41, %43, %44 : vector<8x128xi1>, vector<8x128xf32>
    %c1_i32 = arith.constant 1 : i32
    %46 = vector.broadcast %c1_i32 : i32 to vector<8x128xi32>
    %47 = arith.cmpi eq, %36, %46 : vector<8x128xi32>
    %48 = arith.andi %38, %47 : vector<8x128xi1>
    %cst_11 = arith.constant 0.000000e+00 : f32
    %49 = vector.shape_cast %34 : vector<1x1xf32> to vector<1x1xf32>
    %50 = vector.broadcast %49 : vector<1x1xf32> to vector<8x128xf32>
    %51 = vector.broadcast %cst_11 : f32 to vector<8x128xf32>
    %52 = arith.select %48, %50, %51 : vector<8x128xi1>, vector<8x128xf32>
    %53 = arith.addf %45, %52 : vector<8x128xf32>
    %c0_12 = arith.constant 0 : index
    %c0_13 = arith.constant 0 : index
    %54 = vector.load %arg4[%c0_12, %c0_13] : memref<8x128xf32, #tpu.memory_space<vmem>>, vector<8x128xf32>
    tpu.vector_store %arg4[%c0_12, %c0_13], %53 {strides = array<i32>} : memref<8x128xf32, #tpu.memory_space<vmem>>, vector<8x128xf32>,
    return
  }
  func.func @transform_0(%arg0: i32, %arg1: i32) -> (i32, i32) {
    %c0_i32 = arith.constant 0 : i32
    return %arg0, %arg1 : i32, i32
  }
  func.func @transform_1(%arg0: i32, %arg1: i32) -> (i32, i32) {
    %c0_i32 = arith.constant 0 : i32
    %c0_i32_0 = arith.constant 0 : i32
    return %arg0, %c0_i32 : i32, i32
  }
  func.func @transform_2(%arg0: i32, %arg1: i32) -> (i32, i32) {
    %c0_i32 = arith.constant 0 : i32
    %c0_i32_0 = arith.constant 0 : i32
    return %arg0, %c0_i32 : i32, i32
  }
}

</mosaic_0001>

<bundles_post_ra>
// kernel: tpu_custom_call.1
= control target key start
LH: loop header
LB: loop body
LE: loop exit
PB: predicated region body
PF: predicated region fallthrough
CT: control target
= control target key end

     0   :  { %v161_v2 = vmov 0   ;;  %s210_s0 = inlined_call_operand.vmem [shape: f32[16,128], index: 0, kind: input, shape index: {}]   ;;  %s211_s1 = inlined_call_operand.vmem [shape: s32[16,1], index: 1, kind: input, shape index: {}]   ;;  %s212_s2 = inlined_call_operand.hbm [shape: f32[8,128], index: 2, kind: output, shape index: {}]  }
   0x1   :  { %v12_v0 = vld [vmem:[%s210_s0] sm:$0xff]  ;;  %125 = vset.pattern.permute.xlu1 %v161_v2 }
   0x2   :  { %v14_v1 = vld [vmem:[%s211_s1] sm:$0xff]  ;;  %18 = vmax.xlane.f32.xlu0 %v12_v0 }
   0x3   :  { %7 = vsyncpa [#allocation3], 0  ;;  %33 = vperm.xlu1 %125, %v14_v1   ;;  %126 = vset.pattern.permute.xlu0 %v161_v2  ;;  %v13_v3 = vld [vmem:[%s210_s0 + $0x8] sm:$0xff]  ;;  %v16_v5 = vlaneseq  ;;  %vm52_vm2 = vcmp.ne.s32.totalorder %v14_v1, 4294967196  ;;  %v162_v19 = vmov 0.0   ;;  %vm58_vm4 = vcmask 7168  }
   0x4   :  { %v15_v4 = vld [vmem:[%s211_s1 + $0x8] sm:$0xff]  ;;  %v116_v20 = vsel %vm52_vm2, 1.0, %v162_v19  ;;  %s163_s1 = smov [#allocation2]   ;;  %s107_s21 = sshll.u32 %s212_s2, 4  ;;  %s108_s21 = int_to_ptr.hbm [resolvable:$true] %s107_s21 }
   0x5   :  { %v192_v6 = vand.u32 127, %v16_v5  ;;  %vm53_vm3 = vcmp.ne.s32.totalorder %v15_v4, 4294967196  ;;  %v75_v22 = vsel %vm58_vm4, %v116_v20, 0.0  ;;  %v88_v56 = vshrl.u32 %v16_v5, 7  ;;  %s105_s17 = sshll.u32 %s163_s1, 4  ;;  %s106_s17 = int_to_ptr.vmem [resolvable:$true] %s105_s17 }
   0x6   :  { %v117_v21 = vsel %vm53_vm3, 1.0, %v162_v19 }
   0x7   :  { %v76_v23 = vsel %vm58_vm4, %v117_v21, 0.0  ;;  %vm89_vm5 = vcmp.eq.s32.totalorder %v88_v56, 0  ;;  %vm90_vm6 = vcmp.eq.s32.totalorder %v192_v6, 0  ;;  %vm94_vm7 = vcmp.eq.s32.totalorder %v192_v6, 1 }
   0x8   :  { %v77_v24 = vadd.f32 %v76_v23, %v75_v22  ;;  %vm91_vm8 = vmand %vm89_vm5, %vm90_vm6 }
   0x9   :  { %vm95_vm9 = vmand %vm89_vm5, %vm94_vm7 }
   0xa   :  { %20 = vmax.xlane.f32.xlu0 %v13_v3 }
   0xb   :  { %36 = vperm.xlu1 %125, %v15_v4  }
  0x75   :  { %v19_v7 = vpop.xlane.xlu0 %18  ;;  %v34_v8 = vpop.permute.xlu1 %33 }
  0x76   :  { %v22_v9 = vsub.f32 %v12_v0, %v19_v7  ;;  %vm38_vm0 = vcmp.eq.s32.totalorder %v192_v6, %v34_v8 }
  0x77   :  { %v40_v10 = vsel %vm38_vm0, %v12_v0, 0.0 }
  0x78   :  { %v24_v11 = vmul.f32 1.442695, %v22_v9  ;;  %42 = vadd.xlane.f32.xlu0 %v40_v10 }
  0x7a   :  { %127 = vpow2.f32 %v24_v11 }
  0x7d   :  { %v21_v12 = vpop.xlane.xlu0 %20  ;;  %v37_v13 = vpop.permute.xlu1 %36 }
  0x7e   :  { %v23_v14 = vsub.f32 %v13_v3, %v21_v12  ;;  %vm39_vm1 = vcmp.eq.s32.totalorder %v192_v6, %v37_v13 }
  0x7f   :  { %v41_v15 = vsel %vm39_vm1, %v13_v3, 0.0 }
  0x80   :  { %v128_v16 = vpop.eup %127  ;;  %v26_v17 = vmul.f32 1.442695, %v23_v14  ;;  %44 = vadd.xlane.f32.xlu1 %v41_v15  ;;  %78 = vadd.xlane.f32.xlu0 %v77_v24 }
  0x81   :  { %28 = vadd.xlane.f32.xlu2 %v128_v16 }
  0x82   :  { %129 = vpow2.f32 %v26_v17 }
  0x88   :  { %v130_v18 = vpop.eup %129 }
  0x89   :  { %30 = vadd.xlane.f32.xlu2 %v130_v18 }
  0xeb   :  { %v43_v30 = vpop.xlane.xlu0 %42 }
  0xf3   :  { %v45_v35 = vpop.xlane.xlu1 %44  ;;  %v79_v42 = vpop.xlane.xlu0 %78 }
  0xf4   :  { %v29_v25 = vpop.xlane.xlu2 %28  ;;  %v80_v43 = vrot.slane %v79_v42, 4 }
  0xf5   :  { %131 = vlog2.f32 %v29_v25 }
  0xf6   :  { %v81_v44 = vadd.f32 %v80_v43, %v79_v42 }
  0xf8   :  { %v82_v45 = vrot.slane %v81_v44, 2 }
  0xfa   :  { %v83_v49 = vadd.f32 %v82_v45, %v81_v44 }
  0xfb   :  { %v132_v26 = vpop.eup %131 }
  0xfc   :  { %v47_v27 = vmul.f32 0.6931472, %v132_v26  ;;  %v31_v28 = vpop.xlane.xlu2 %30  ;;  %v84_v52 = vrot.slane %v83_v49, 1 }
  0xfd   :  { %133 = vlog2.f32 %v31_v28 }
  0xfe   :  { %v50_v29 = vadd.f32 %v47_v27, %v19_v7  ;;  %v85_v55 = vadd.f32 %v84_v52, %v83_v49 }
 0x100   :  { %v54_v33 = vsub.f32 %v50_v29, %v43_v30 }
 0x102   :  { %v56_v37 = vsel %vm52_vm2, %v54_v33, 0.0 }
 0x103   :  { %v134_v31 = vpop.eup %133  ;;  %v59_v39 = vsel %vm58_vm4, %v56_v37, 0.0 }
 0x104   :  { %v49_v32 = vmul.f32 0.6931472, %v134_v31 }
 0x106   :  { %v51_v34 = vadd.f32 %v49_v32, %v21_v12 }
 0x108   :  { %v55_v36 = vsub.f32 %v51_v34, %v45_v35 }
 0x10a   :  { %v57_v38 = vsel %vm53_vm3, %v55_v36, 0.0 }
 0x10b   :  { %v60_v40 = vsel %vm58_vm4, %v57_v38, 0.0 }
 0x10c   :  { %v61_v41 = vadd.f32 %v60_v40, %v59_v39 }
 0x10e   :  { %62 = vadd.xlane.f32.xlu2 %v61_v41 }
 0x181   :  { %v63_v46 = vpop.xlane.xlu2 %62 }
 0x182   :  { %v64_v47 = vrot.slane %v63_v46, 4 }
 0x184   :  { %v65_v48 = vadd.f32 %v64_v47, %v63_v46 }
 0x186   :  { %v66_v50 = vrot.slane %v65_v48, 2 }
 0x188   :  { %v67_v51 = vadd.f32 %v66_v50, %v65_v48 }
 0x18a   :  { %v68_v53 = vrot.slane %v67_v51, 1 }
 0x18c   :  { %v69_v54 = vadd.f32 %v68_v53, %v67_v51 }
 0x18e   :  { %118 = vpush %v69_v54 }
 0x18f   :  { %120 = vpush %v85_v55 }
 0x1bf   :  { %s119_s0 = spop %118 }
 0x1c0   :  { %v92_v57 = vstv %s119_s0  ;;  %s121_s18 = spop %120 }
 0x1c1   :  { %v93_v58 = vsel %vm91_vm8, %v92_v57, 0.0  ;;  %v96_v59 = vstv %s121_s18 }
 0x1c2   :  { %v97_v60 = vsel %vm95_vm9, %v96_v59, 0.0 }
 0x1c3   :  { %v98_v61 = vadd.f32 %v97_v60, %v93_v58 }
 0x1c5   :  { %99 = vst [vmem:[#allocation2] sm:$0xff] %v98_v61 }
 0x1c6   :  { %110 = dma.vmem_to_hbm [thread:$0]  %s106_s17, 128, %s108_s21, [#allocation3]  }
 0x1c7   :  { %159 = dma.done.wait [#allocation3], 128  }
 0x1c8   :  { %160 = vsyncadd [#allocation3], 4294967168 }
 0x1c9   :  { %115 = vsyncpa [#allocation3], 1 }

</bundles_post_ra>
